<compile_context>
chip_gen: v7x
topology: tpu7x:2x2x1
jax: 0.10.0
libtpu: 0.0.40
codegen_flags: <defaults>
</compile_context>

<pallas_src>
import numpy as np
import jax
import jax.numpy as jnp
from jax import lax
from jax.experimental import pallas as pl
from jax.experimental.pallas import tpu as pltpu

CONNECTED_LIMBS = ((0, 1), (0, 2), (0, 3), (2, 4), (2, 5), (3, 6), (3, 7),
                   (4, 8), (5, 7), (5, 9), (6, 10), (7, 11), (9, 12), (11, 13))
NUM_LIMBS = len(CONNECTED_LIMBS)   # 14
NUM_JOINTS = 14
JOINT_DIM = 3
FLAT = NUM_JOINTS * JOINT_DIM      # 42
EPS = 1e-8                         # F.cosine_similarity eps

# Static constant matrices (built once on host).
#   vp = p @ _DT      : vp[:, 3l+k] = p[:, 3a+k] - p[:, 3b+k]   for limb l = (a, b)
#   w  = (vp*vg) @ _R : w[:, l]     = sum_k (vp*vg)[:, 3l+k]
_DT_np = np.zeros((FLAT, FLAT), np.float32)
_R_np = np.zeros((FLAT, NUM_LIMBS), np.float32)
for _l, (_a, _b) in enumerate(CONNECTED_LIMBS):
    for _k in range(JOINT_DIM):
        _DT_np[3 * _a + _k, 3 * _l + _k] += 1.0
        _DT_np[3 * _b + _k, 3 * _l + _k] -= 1.0
        _R_np[3 * _l + _k, _l] = 1.0
_DT = jnp.asarray(_DT_np)
_R = jnp.asarray(_R_np)


def _limb_loss_kernel(dT_ref, r_ref, pred_ref, gt_ref, out_ref):
    # dT_ref: (42, 42) f32; r_ref: (42, 14) f32
    # pred_ref/gt_ref: (TN, 42) native dtype; out_ref: (TN, 14) f32
    dT = dT_ref[...]
    r = r_ref[...]
    p = pred_ref[...].astype(jnp.float32)
    g = gt_ref[...].astype(jnp.float32)

    # Limb differencing on the MXU (K=42; kernel is memory-bound, underfill OK).
    vp = jnp.dot(p, dT, preferred_element_type=jnp.float32)   # (TN, 42)
    vg = jnp.dot(g, dT, preferred_element_type=jnp.float32)   # (TN, 42)

    # Group-of-3 summation on the MXU -> (TN, 14) dot / squared-norm terms.
    w12 = jnp.dot(vp * vg, r, preferred_element_type=jnp.float32)
    w1 = jnp.dot(vp * vp, r, preferred_element_type=jnp.float32)
    w2 = jnp.dot(vg * vg, r, preferred_element_type=jnp.float32)

    # cos = w12 / (max(||vp||, eps) * max(||vg||, eps))  (matches F.cosine_similarity;
    # rsqrt(max(w, eps^2)) == 1 / max(sqrt(w), eps)), computed on the EUP.
    cos = (w12
           * lax.rsqrt(jnp.maximum(w1, EPS * EPS))
           * lax.rsqrt(jnp.maximum(w2, EPS * EPS)))
    out_ref[...] = 1.0 - cos


def limb_loss_pallas(pred, gt, weight=None, mask=None, reduction='none',
                     avg_factor=None, loss_weight=1.0, block_n=8192):
    """LimbLoss.forward equivalent (weight/reduction glue in plain JAX)."""
    # `mask` is accepted but unused, matching the original limb_loss body.
    del mask
    flat_p = jnp.asarray(pred).reshape(-1, FLAT)   # keep native dtype (bf16 OK)
    flat_g = jnp.asarray(gt).reshape(-1, FLAT)
    n = flat_p.shape[0]

    # Row tile: multiple of 8, never larger than needed for the problem.
    tile_n = max(8, min(block_n, ((n + 7) // 8) * 8))
    grid = (pl.cdiv(n, tile_n),)

    loss = pl.pallas_call(
        _limb_loss_kernel,
        out_shape=jax.ShapeDtypeStruct((n, NUM_LIMBS), jnp.float32),
        grid=grid,
        in_specs=[
            pl.BlockSpec((FLAT, FLAT), lambda i: (0, 0)),        # DT (VMEM-resident)
            pl.BlockSpec((FLAT, NUM_LIMBS), lambda i: (0, 0)),   # R  (VMEM-resident)
            pl.BlockSpec((tile_n, FLAT), lambda i: (i, 0)),      # pred rows
            pl.BlockSpec((tile_n, FLAT), lambda i: (i, 0)),      # gt rows
        ],
        out_specs=pl.BlockSpec((tile_n, NUM_LIMBS), lambda i: (i, 0)),
        compiler_params=pltpu.CompilerParams(
            dimension_semantics=("parallel",),     # rows split across TCs on v7x
            vmem_limit_bytes=40 * 1024 * 1024),    # fits tile_n=8192; < v7x 64 MiB
    )(_DT, _R, flat_p, flat_g)

    # Ragged tail rows (if any) are implicitly dropped: out_shape is exactly (n, 14).

    # mmdet weighted_loss semantics: elementwise weight, then reduce, then scale.
    if weight is not None:
        loss = loss * weight
    if reduction == 'mean':
        loss = loss.sum() / avg_factor if avg_factor is not None else loss.mean()
    elif reduction == 'sum':
        loss = loss.sum()
    return loss_weight * loss


def _limb_loss_ref(pred, gt):
    """Pure-JAX reference of limb_loss (reduction='none')."""
    p = jnp.asarray(pred, jnp.float32).reshape(-1, NUM_JOINTS, JOINT_DIM)
    g = jnp.asarray(gt, jnp.float32).reshape(-1, NUM_JOINTS, JOINT_DIM)
    limbs = jnp.array(CONNECTED_LIMBS, jnp.int32)
    vp = p[:, limbs[:, 0], :] - p[:, limbs[:, 1], :]
    vg = g[:, limbs[:, 0], :] - g[:, limbs[:, 1], :]
    w12 = jnp.sum(vp * vg, axis=-1)
    w1 = jnp.sum(vp * vp, axis=-1)
    w2 = jnp.sum(vg * vg, axis=-1)
    cos = w12 / (jnp.maximum(jnp.sqrt(w1), EPS) * jnp.maximum(jnp.sqrt(w2), EPS))
    return 1.0 - cos


if __name__ == "__main__":
    # LimbLoss has no learnable parameters (reduction='none', loss_weight=1.0).
    key = jax.random.PRNGKey(0)
    k1, k2 = jax.random.split(key)
    # NCHW input whose total size is divisible by 42: [bs=2, c=42, h=4, w=4] -> N = 32
    pred = jax.random.normal(k1, (2, 42, 4, 4), dtype=jnp.float32)
    target = jax.random.normal(k2, (2, 42, 4, 4), dtype=jnp.float32)

    out = limb_loss_pallas(pred, target, reduction='none', loss_weight=1.0)
    out = jax.block_until_ready(out)

    ref = _limb_loss_ref(pred, target)
    assert out.shape == (32, 14), out.shape
    assert jnp.allclose(out, ref, atol=1e-5, rtol=1e-5), \
        float(jnp.max(jnp.abs(out - ref)))
    print("KERNEL_OK")
</pallas_src>

<mosaic_0001>
module attributes {stable_mosaic.version = 11 : i64} {
  func.func @_limb_loss_kernel(%arg0: i32, %arg1: memref<42x42xf32, #tpu.memory_space<vmem>>, %arg2: memref<42x14xf32, #tpu.memory_space<vmem>>, %arg3: memref<32x42xf32, #tpu.memory_space<vmem>>, %arg4: memref<32x42xf32, #tpu.memory_space<vmem>>, %arg5: memref<32x14xf32, #tpu.memory_space<vmem>>) attributes {dimension_semantics = [#tpu.dimension_semantics<parallel>], iteration_bounds = array<i64: 1>, scalar_prefetch = 0 : i64, scratch_operands = 0 : i64, tpu.core_type = #tpu.core_type<tc>, window_params = [{pipeline_mode = #tpu.pipeline_mode<synchronous>, transform_indices = @transform_0, window_bounds = array<i64: 42, 42>}, {pipeline_mode = #tpu.pipeline_mode<synchronous>, transform_indices = @transform_1, window_bounds = array<i64: 42, 14>}, {transform_indices = @transform_2, window_bounds = array<i64: 32, 42>}, {transform_indices = @transform_3, window_bounds = array<i64: 32, 42>}, {transform_indices = @transform_4, window_bounds = array<i64: 32, 14>}]} {
    %c0 = arith.constant 0 : index
    %c0_0 = arith.constant 0 : index
    %0 = vector.load %arg1[%c0, %c0_0] : memref<42x42xf32, #tpu.memory_space<vmem>>, vector<42x42xf32>
    %c0_1 = arith.constant 0 : index
    %c0_2 = arith.constant 0 : index
    %1 = vector.load %arg2[%c0_1, %c0_2] : memref<42x14xf32, #tpu.memory_space<vmem>>, vector<42x14xf32>
    %c0_3 = arith.constant 0 : index
    %c0_4 = arith.constant 0 : index
    %2 = vector.load %arg3[%c0_3, %c0_4] : memref<32x42xf32, #tpu.memory_space<vmem>>, vector<32x42xf32>
    %c0_5 = arith.constant 0 : index
    %c0_6 = arith.constant 0 : index
    %3 = vector.load %arg4[%c0_5, %c0_6] : memref<32x42xf32, #tpu.memory_space<vmem>>, vector<32x42xf32>
    %cst = arith.constant dense<0.000000e+00> : vector<32x42xf32>
    %4 = tpu.matmul %2, %0, %cst {dimension_numbers = #tpu.dot_dimension_numbers<[1], [0], [0], [1], [0, 0, 1, 1], [], []>} : vector<32x42xf32>, vector<42x42xf32>, vector<32x42xf32> -> vector<32x42xf32>
    %cst_7 = arith.constant dense<0.000000e+00> : vector<32x42xf32>
    %5 = tpu.matmul %3, %0, %cst_7 {dimension_numbers = #tpu.dot_dimension_numbers<[1], [0], [0], [1], [0, 0, 1, 1], [], []>} : vector<32x42xf32>, vector<42x42xf32>, vector<32x42xf32> -> vector<32x42xf32>
    %6 = arith.mulf %4, %5 : vector<32x42xf32>
    %cst_8 = arith.constant dense<0.000000e+00> : vector<32x14xf32>
    %7 = tpu.matmul %6, %1, %cst_8 {dimension_numbers = #tpu.dot_dimension_numbers<[1], [0], [0], [1], [0, 0, 1, 1], [], []>} : vector<32x42xf32>, vector<42x14xf32>, vector<32x14xf32> -> vector<32x14xf32>
    %8 = arith.mulf %4, %4 : vector<32x42xf32>
    %cst_9 = arith.constant dense<0.000000e+00> : vector<32x14xf32>
    %9 = tpu.matmul %8, %1, %cst_9 {dimension_numbers = #tpu.dot_dimension_numbers<[1], [0], [0], [1], [0, 0, 1, 1], [], []>} : vector<32x42xf32>, vector<42x14xf32>, vector<32x14xf32> -> vector<32x14xf32>
    %10 = arith.mulf %5, %5 : vector<32x42xf32>
    %cst_10 = arith.constant dense<0.000000e+00> : vector<32x14xf32>
    %11 = tpu.matmul %10, %1, %cst_10 {dimension_numbers = #tpu.dot_dimension_numbers<[1], [0], [0], [1], [0, 0, 1, 1], [], []>} : vector<32x42xf32>, vector<42x14xf32>, vector<32x14xf32> -> vector<32x14xf32>
    %cst_11 = arith.constant 1.000000e-16 : f32
    %12 = vector.broadcast %cst_11 : f32 to vector<32x14xf32>
    %13 = arith.maximumf %9, %12 : vector<32x14xf32>
    %14 = math.rsqrt %13 : vector<32x14xf32>
    %15 = arith.mulf %7, %14 : vector<32x14xf32>
    %cst_12 = arith.constant 1.000000e-16 : f32
    %16 = vector.broadcast %cst_12 : f32 to vector<32x14xf32>
    %17 = arith.maximumf %11, %16 : vector<32x14xf32>
    %18 = math.rsqrt %17 : vector<32x14xf32>
    %19 = arith.mulf %15, %18 : vector<32x14xf32>
    %cst_13 = arith.constant 1.000000e+00 : f32
    %20 = vector.broadcast %cst_13 : f32 to vector<32x14xf32>
    %21 = arith.subf %20, %19 : vector<32x14xf32>
    %c0_14 = arith.constant 0 : index
    %c0_15 = arith.constant 0 : index
    %22 = vector.load %arg5[%c0_14, %c0_15] : memref<32x14xf32, #tpu.memory_space<vmem>>, vector<32x14xf32>
    tpu.vector_store %arg5[%c0_14, %c0_15], %21 {strides = array<i32>} : memref<32x14xf32, #tpu.memory_space<vmem>>, vector<32x14xf32>,
    return
  }
  func.func @transform_0(%arg0: i32) -> (i32, i32) {
    %c0_i32 = arith.constant 0 : i32
    %c0_i32_0 = arith.constant 0 : i32
    %c0_i32_1 = arith.constant 0 : i32
    return %c0_i32, %c0_i32_0 : i32, i32
  }
  func.func @transform_1(%arg0: i32) -> (i32, i32) {
    %c0_i32 = arith.constant 0 : i32
    %c0_i32_0 = arith.constant 0 : i32
    %c0_i32_1 = arith.constant 0 : i32
    return %c0_i32, %c0_i32_0 : i32, i32
  }
  func.func @transform_2(%arg0: i32) -> (i32, i32) {
    %c0_i32 = arith.constant 0 : i32
    %c0_i32_0 = arith.constant 0 : i32
    return %arg0, %c0_i32 : i32, i32
  }
  func.func @transform_3(%arg0: i32) -> (i32, i32) {
    %c0_i32 = arith.constant 0 : i32
    %c0_i32_0 = arith.constant 0 : i32
    return %arg0, %c0_i32 : i32, i32
  }
  func.func @transform_4(%arg0: i32) -> (i32, i32) {
    %c0_i32 = arith.constant 0 : i32
    %c0_i32_0 = arith.constant 0 : i32
    return %arg0, %c0_i32 : i32, i32
  }
}

</mosaic_0001>

<bundles_post_ra>
// kernel: tpu_custom_call.1
= control target key start
LH: loop header
LB: loop body
LE: loop exit
PB: predicated region body
PF: predicated region fallthrough
CT: control target
= control target key end

     0   :  { %9 = vsyncpa [#allocation3], 0  ;;  %s1069_s0 = inlined_call_operand.vmem [shape: f32[42,42], index: 0, kind: input, shape index: {}]   ;;  %s1070_s1 = inlined_call_operand.vmem [shape: f32[42,14], index: 1, kind: input, shape index: {}]   ;;  %s1071_s2 = inlined_call_operand.hbm [shape: f32[32,42], index: 2, kind: input, shape index: {}]   ;;  %s1072_s3 = inlined_call_operand.hbm [shape: f32[32,42], index: 3, kind: input, shape index: {}]   ;;  %s1073_s4 = inlined_call_operand.vmem [shape: f32[32,14], index: 4, kind: output, shape index: {}]  }
   0x1   :  { %10 = vsyncpa [#allocation5], 0  ;;  %s919_s15 = smov [#allocation2]   ;;  %s871_s19 = scalar_lea.hbm %s1071_s2, 512 }
   0x2   :  { %s20_s16 = sshll.u32 %s919_s15, 4  ;;  %p872_p0 = scmp.ne.s32.totalorder %s1071_s2, %s871_s19  ;;  %s21_s16 = int_to_ptr.vmem [resolvable:$true] %s20_s16 }
   0x3   :  { %p875_p1 = scmp.lt.u32.totalorder %s871_s19, %s1071_s2 }
   0x5   :  { %p877_p2 = pnand %p875_p1, %p872_p0 }
   0x7   :  { %880 = shalt.err (!%p877_p2)
}
   0x8   :  { %s881_s24 = scalar_lea.vmem %s21_s16, 512  ;;  %p886_p4 = scmp.lt.s32.totalorder %s21_s16, %s21_s16 }
   0x9   :  { %p882_p3 = scmp.ne.s32.totalorder %s21_s16, %s881_s24  ;;  %p887_p5 = scmp.lt.s32.totalorder %s881_s24, %s881_s24 }
   0xb   :  { %p888_p6 = por %p887_p5, %p886_p4 }
   0xd   :  { %p889_p7 = pnand %p888_p6, %p882_p3 }
   0xf   :  { %892 = shalt.err (!%p889_p7)
}
  0x10   :  { %s920_s25 = smov 128   ;;  %s921_s26 = smov 8  }
  0x11   :  { %26 = dma.hbm_to_vmem [thread:$0]  %s1071_s2, 512, %s21_s16, [#allocation3], %s920_s25, %s920_s25, %s921_s26  }
  0x12   :  { %s922_s29 = smov [#allocation4]   ;;  %s893_s7 = scalar_lea.hbm %s1072_s3, 512 }
  0x13   :  { %s32_s30 = sshll.u32 %s922_s29, 4  ;;  %p894_p8 = scmp.ne.s32.totalorder %s1072_s3, %s893_s7  ;;  %s33_s30 = int_to_ptr.vmem [resolvable:$true] %s32_s30 }
  0x14   :  { %p897_p9 = scmp.lt.u32.totalorder %s893_s7, %s1072_s3 }
  0x16   :  { %p899_p10 = pnand %p897_p9, %p894_p8 }
  0x18   :  { %902 = shalt.err (!%p899_p10)
}
  0x19   :  { %s903_s12 = scalar_lea.vmem %s33_s30, 512  ;;  %p908_p12 = scmp.lt.s32.totalorder %s33_s30, %s33_s30 }
  0x1a   :  { %p904_p11 = scmp.ne.s32.totalorder %s33_s30, %s903_s12  ;;  %p909_p13 = scmp.lt.s32.totalorder %s903_s12, %s903_s12 }
  0x1c   :  { %p910_p0 = por %p909_p13, %p908_p12 }
  0x1e   :  { %p911_p1 = pnand %p910_p0, %p904_p11 }
  0x20   :  { %914 = shalt.err (!%p911_p1)
}
  0x21   :  { %38 = dma.hbm_to_vmem [thread:$0]  %s1072_s3, 512, %s33_s30, [#allocation5], %s920_s25, %s920_s25, %s921_s26  }
  0x22   :  { %915 = dma.done.wait [#allocation3], 512  }
  0x23   :  { %916 = vsyncadd [#allocation3], 4294966784 }
  0x24   :  { %917 = dma.done.wait [#allocation5], 512  }
  0x25   :  { %918 = vsyncadd [#allocation5], 4294966784  ;;  %v45_v0 = vld [vmem:[%s1069_s0] sm:$0xff]  ;;  %v46_v1 = vld [vmem:[%s1069_s0 + $0x8] sm:$0xff]  ;;  %vm78_vm0 = vcmask 1041408   ;;  %vm65_vm1 = vcmask 343040  }
  0x26   :  { %v47_v2 = vld [vmem:[%s1069_s0 + $0x10] sm:$0xff]  ;;  %v774_v3 = vpack.c.bf16 %v46_v1, %v45_v0  ;;  %v48_v4 = vld [vmem:[%s1069_s0 + $0x18] sm:$0xff]  ;;  %v49_v6 = vld [vmem:[%s1069_s0 + $0x20] sm:$0xff]  ;;  %vm923_vm2 = vmmov 1   ;;  %vm598_vm4 = vcmask 113664  }
  0x27   :  { %v778_v5 = vpack.c.bf16 %v48_v4, %v47_v2  ;;  %v50_v7 = vld [vmem:[%s1069_s0 + $0x28] sm:$0x3]  ;;  %v57_v8 = vld [vmem:[#allocation2] sm:$0xff]  ;;  %vm991_vm3 = vmpackc.low %vm78_vm0, %vm923_vm2 }
  0x28   :  { %775 = vmatprep.subr.bf16.mxu0 %v774_v3  ;;  %789 = vmatprep.subr.bf16.mxu1 %v774_v3  ;;  %v61_v9 = vld [vmem:[#allocation4] sm:$0xff]  ;;  %v782_v10 = vpack.c.bf16 %v50_v7, %v49_v6  ;;  %v52_v13 = vld [vmem:[%s1070_s1 + $0x8] sm:$0xff]  ;;  %v53_v15 = vld [vmem:[%s1070_s1 + $0x10] sm:$0xff] }
  0x29   :  { %777 = vmatpush3.bf16.msra.mxu0 %v774_v3  ;;  %791 = vmatpush3.bf16.msra.mxu1 %v774_v3  ;;  %v51_v12 = vld [vmem:[%s1070_s1] sm:$0xff]  ;;  %v54_v16 = vld [vmem:[%s1070_s1 + $0x18] sm:$0xff]  ;;  %v58_v17 = vld [vmem:[#allocation2 + $0x8] sm:$0xff] }
  0x2a   :  { %779 = vmatprep.subr.bf16.mxu0 %v778_v5  ;;  %793 = vmatprep.subr.bf16.mxu1 %v778_v5  ;;  %v802_v14 = vpack.c.bf16 %v52_v13, %v51_v12  ;;  %v62_v18 = vld [vmem:[#allocation4 + $0x8] sm:$0xff]  ;;  %v59_v19 = vld [vmem:[#allocation2 + $0x10] sm:$0xff]  ;;  %v806_v21 = vpack.c.bf16 %v54_v16, %v53_v15  ;;  %v60_v22 = vld [vmem:[#allocation2 + $0x18] sm:$0xff] }
  0x2b   :  { %696 = vmatprep.mubr.msk.f32.mxu0 %vm65_vm1, %v57_v8  ;;  %714 = vmatprep.mubr.msk.f32.mxu1 %vm65_vm1, %v61_v9  ;;  %v63_v20 = vld [vmem:[#allocation4 + $0x10] sm:$0xff]  ;;  %v64_v23 = vld [vmem:[#allocation4 + $0x18] sm:$0xff]  ;;  %v55_v24 = vld [vmem:[%s1070_s1 + $0x20] sm:$0xff] }
  0x2c   :  { %v56_v25 = vld [vmem:[%s1070_s1 + $0x28] sm:$0x3] }
  0x2d   :  { %781 = vmatpush3.bf16.msra.mxu0 %v778_v5  ;;  %795 = vmatpush3.bf16.msra.mxu1 %v778_v5  ;;  %v810_v26 = vpack.c.bf16 %v56_v25, %v55_v24 }
  0x2e   :  { %784 = vmatprep.subr.msk.bf16.mxu0 %vm991_vm3, %v782_v10  ;;  %798 = vmatprep.subr.msk.bf16.mxu1 %vm991_vm3, %v782_v10 }
  0x31   :  { %787 = vmatpush3.bf16.msk.msra.mxu0 %vm991_vm3, %v782_v10  ;;  %801 = vmatpush3.bf16.msk.msra.mxu1 %vm991_vm3, %v782_v10 }
  0x32   :  { %803 = vmatprep.subr.bf16.mxu0 %v802_v14  ;;  %817 = vmatprep.subr.bf16.mxu1 %v802_v14 }
  0x34   :  { %697 = vmatmul.mubr.msk.f32.vlgmr.msra.gmra.mrb[0].mxu0 %vm65_vm1, %v58_v17  ;;  %715 = vmatmul.mubr.msk.f32.vlgmr.msra.gmra.mrb[0].mxu1 %vm65_vm1, %v62_v18 }
  0x35   :  { %699 = vmatprep.mubr.msk.f32.mxu0 %vm65_vm1, %v59_v19  ;;  %717 = vmatprep.mubr.msk.f32.mxu1 %vm65_vm1, %v63_v20 }
  0x36   :  { %805 = vmatpush3.bf16.msra.mxu0 %v802_v14  ;;  %819 = vmatpush3.bf16.msra.mxu1 %v802_v14 }
  0x37   :  { %807 = vmatprep.subr.bf16.mxu0 %v806_v21  ;;  %821 = vmatprep.subr.bf16.mxu1 %v806_v21 }
  0x38   :  { %700 = vmatmul.mubr.msk.f32.gmra.mrb[2].mxu0 %vm65_vm1, %v60_v22  ;;  %718 = vmatmul.mubr.msk.f32.gmra.mrb[2].mxu1 %vm65_vm1, %v64_v23 }
  0x3a   :  { %809 = vmatpush3.bf16.msra.mxu0 %v806_v21  ;;  %823 = vmatpush3.bf16.msra.mxu1 %v806_v21 }
  0x3b   :  { %812 = vmatprep.subr.msk.bf16.mxu0 %vm991_vm3, %v810_v26  ;;  %826 = vmatprep.subr.msk.bf16.mxu1 %vm991_vm3, %v810_v26 }
  0x3e   :  { %815 = vmatpush3.bf16.msk.msra.mxu0 %vm991_vm3, %v810_v26  ;;  %829 = vmatpush3.bf16.msk.msra.mxu1 %vm991_vm3, %v810_v26 }
  0x3f   :  { %831 = vmatprep.subr.bf16.mxu0 %v802_v14  ;;  %844 = vmatprep.subr.bf16.mxu1 %v802_v14 }
 0x107   :  { %v698_v27 = vpop.f32.mrb[0].mxu0  ;;  %v716_v28 = vpop.f32.mrb[0].mxu1 }
 0x108   :  { %v265_v29 = vmul.f32 %v716_v28, %v698_v27  ;;  %v148_v30 = vpop.f32.mrb[1].mxu0  ;;  %v245_v31 = vpop.f32.mrb[1].mxu1  ;;  %v369_v34 = vmul.f32 %v698_v27, %v698_v27  ;;  %v470_v45 = vmul.f32 %v716_v28, %v716_v28 }
 0x109   :  { %v368_v32 = vmul.f32 %v148_v30, %v148_v30  ;;  %v264_v33 = vmul.f32 %v245_v31, %v148_v30  ;;  %v469_v44 = vmul.f32 %v245_v31, %v245_v31 }
 0x10b   :  { %v701_v35 = vpop.f32.mrb[2].mxu0  ;;  %v719_v36 = vpop.f32.mrb[2].mxu1  ;;  %732 = vmatprep.mubr.msk.f32.mxu0 %vm65_vm1, %v264_v33  ;;  %750 = vmatprep.mubr.msk.f32.mxu1 %vm65_vm1, %v368_v32 }
 0x10c   :  { %v371_v37 = vmul.f32 %v701_v35, %v701_v35  ;;  %v267_v38 = vmul.f32 %v719_v36, %v701_v35  ;;  %v158_v39 = vpop.f32.mrb[3].mxu0  ;;  %v255_v40 = vpop.f32.mrb[3].mxu1  ;;  %733 = vmatmul.mubr.msk.f32.vlgmr.msra.gmra.mrb[4].mxu0 %vm65_vm1, %v265_v29  ;;  %751 = vmatmul.mubr.msk.f32.vlgmr.msra.gmra.mrb[4].mxu1 %vm65_vm1, %v369_v34  ;;  %v472_v46 = vmul.f32 %v719_v36, %v719_v36 }
 0x10d   :  { %v370_v41 = vmul.f32 %v158_v39, %v158_v39  ;;  %v266_v42 = vmul.f32 %v255_v40, %v158_v39  ;;  %833 = vmatpush3.bf16.msra.mxu0 %v802_v14  ;;  %847 = vmatpush3.bf16.msra.mxu1 %v802_v14  ;;  %v471_v43 = vmul.f32 %v255_v40, %v255_v40 }
 0x10e   :  { %835 = vmatprep.subr.bf16.mxu0 %v806_v21  ;;  %845 = vmatprep.subr.bf16.mxu1 %v806_v21 }
 0x10f   :  { %735 = vmatprep.mubr.msk.f32.mxu0 %vm65_vm1, %v266_v42  ;;  %753 = vmatprep.mubr.msk.f32.mxu1 %vm65_vm1, %v370_v41 }
 0x110   :  { %736 = vmatmul.mubr.msk.f32.gmra.mrb[6].mxu0 %vm65_vm1, %v267_v38  ;;  %754 = vmatmul.mubr.msk.f32.gmra.mrb[6].mxu1 %vm65_vm1, %v371_v37 }
 0x111   :  { %837 = vmatpush3.bf16.msra.mxu0 %v806_v21  ;;  %848 = vmatpush3.bf16.msra.mxu1 %v806_v21 }
 0x112   :  { %768 = vmatprep.mubr.msk.f32.mxu0 %vm65_vm1, %v469_v44  ;;  %771 = vmatprep.mubr.msk.f32.mxu1 %vm65_vm1, %v471_v43 }
 0x113   :  { %840 = vmatprep.subr.msk.bf16.mxu0 %vm991_vm3, %v810_v26  ;;  %846 = vmatprep.subr.msk.bf16.mxu1 %vm991_vm3, %v810_v26 }
 0x115   :  { %843 = vmatpush3.bf16.msk.msra.mxu0 %vm991_vm3, %v810_v26  ;;  %849 = vmatpush3.bf16.msk.msra.mxu1 %vm991_vm3, %v810_v26 }
 0x118   :  { %769 = vmatmul.mubr.msk.f32.vlgmr.msra.gmra.mrb[8].mxu0 %vm65_vm1, %v470_v45  ;;  %772 = vmatmul.mubr.msk.f32.vlgmr.msra.gmra.mrb[8].mxu1 %vm65_vm1, %v472_v46 }
 0x1df   :  { %v734_v47 = vpop.f32.mrb[4].mxu0  ;;  %v752_v48 = vpop.f32.mrb[4].mxu1 }
 0x1e0   :  { %v571_v49 = vmax.f32 %v752_v48, 1e-16  ;;  %v349_v50 = vpop.f32.mrb[5].mxu0  ;;  %v450_v51 = vpop.f32.mrb[5].mxu1 }
 0x1e1   :  { %v570_v52 = vmax.f32 %v450_v51, 1e-16 }
 0x1e2   :  { %855 = vrsqrt.f32 %v571_v49 }
 0x1e3   :  { %857 = vrsqrt.f32 %v570_v52  ;;  %v737_v53 = vpop.f32.mrb[6].mxu0  ;;  %v755_v54 = vpop.f32.mrb[6].mxu1 }
 0x1e4   :  { %v573_v55 = vmax.f32 %v755_v54, 1e-16  ;;  %v359_v56 = vpop.f32.mrb[7].mxu0  ;;  %v460_v57 = vpop.f32.mrb[7].mxu1 }
 0x1e5   :  { %v572_v58 = vmax.f32 %v460_v57, 1e-16 }
 0x1e6   :  { %859 = vrsqrt.f32 %v573_v55 }
 0x1e7   :  { %861 = vrsqrt.f32 %v572_v58 }
 0x1eb   :  { %v770_v59 = vpop.f32.mrb[8].mxu0  ;;  %v773_v60 = vpop.f32.mrb[8].mxu1 }
 0x1ec   :  { %v856_v61 = vpop.eup %855  ;;  %v583_v62 = vmax.f32 %v770_v59, 1e-16  ;;  %v585_v63 = vmax.f32 %v773_v60, 1e-16  ;;  %v551_v0 = vpop.f32.mrb[9].mxu0 }
 0x1ed   :  { %v561_v1 = vpop.f32.mrb[9].mxu1  ;;  %v858_v2 = vpop.eup %857  ;;  %v579_v3 = vmul.f32 %v856_v61, %v734_v47  ;;  %v582_v4 = vmax.f32 %v551_v0, 1e-16 }
 0x1ee   :  { %v584_v5 = vmax.f32 %v561_v1, 1e-16  ;;  %v578_v6 = vmul.f32 %v858_v2, %v349_v50  ;;  %863 = vrsqrt.f32 %v583_v62 }
 0x1ef   :  { %865 = vrsqrt.f32 %v585_v63 }
 0x1f0   :  { %v860_v7 = vpop.eup %859  ;;  %867 = vrsqrt.f32 %v582_v4 }
 0x1f1   :  { %v862_v8 = vpop.eup %861  ;;  %v581_v9 = vmul.f32 %v860_v7, %v737_v53  ;;  %869 = vrsqrt.f32 %v584_v5 }
 0x1f2   :  { %v580_v10 = vmul.f32 %v862_v8, %v359_v56 }
 0x1f8   :  { %v864_v11 = vpop.eup %863 }
 0x1f9   :  { %v866_v12 = vpop.eup %865  ;;  %v591_v13 = vmul.f32 %v864_v11, %v579_v3 }
 0x1fa   :  { %v868_v14 = vpop.eup %867  ;;  %v593_v15 = vmul.f32 %v866_v12, %v581_v9 }
 0x1fb   :  { %v870_v16 = vpop.eup %869  ;;  %v595_v17 = vsub.f32 1.0, %v591_v13  ;;  %v590_v18 = vmul.f32 %v868_v14, %v578_v6 }
 0x1fc   :  { %v597_v19 = vsub.f32 1.0, %v593_v15  ;;  %v592_v20 = vmul.f32 %v870_v16, %v580_v10 }
 0x1fd   :  { %600 = vst.msk [vmem:[%s1073_s4 + $0x8] sm:$0xff] %vm598_vm4, %v595_v17  ;;  %v594_v21 = vsub.f32 1.0, %v590_v18 }
 0x1fe   :  { %602 = vst.msk [vmem:[%s1073_s4 + $0x18] sm:$0xff] %vm598_vm4, %v597_v19  ;;  %v596_v22 = vsub.f32 1.0, %v592_v20 }
 0x1ff   :  { %599 = vst.msk [vmem:[%s1073_s4] sm:$0xff] %vm598_vm4, %v594_v21 }
 0x200   :  { %601 = vst.msk [vmem:[%s1073_s4 + $0x10] sm:$0xff] %vm598_vm4, %v596_v22 }
 0x201   :  { %607 = vsyncpa [#allocation3], 1 }
 0x202   :  { %608 = vsyncpa [#allocation5], 1 }

</bundles_post_ra>
